<compile_context>
chip_gen: v6e
topology: v6e:2x2x1
jax: 0.10.0
libtpu: 0.0.40
codegen_flags: <defaults>
</compile_context>

<pallas_src>
import math

import jax
import jax.numpy as jnp
from jax.experimental import pallas as pl
from jax.experimental.pallas import tpu as pltpu


# ----------------------------------------------------------------------------
# Pallas kernel
# ----------------------------------------------------------------------------

def _dr_kernel(x_ref, w_ref, bias_ref, o_ref):
    # x_ref   : (Cin, TM)  f32 activations (batch dim squeezed), HW on lanes.
    # w_ref   : (Cout, Cin) bf16 weight with BN scale pre-folded (resident).
    # bias_ref: (Cout, 1)  f32 fused BN bias.
    # o_ref   : (Cout, TM) output tile (lane-dense store).
    x_bf16 = x_ref[...].astype(jnp.bfloat16)           # in-kernel cast (free on VPU)
    acc = jnp.dot(w_ref[...], x_bf16,
                  preferred_element_type=jnp.float32)  # (Cout, TM) f32 on MXU
    y = acc + bias_ref[...]                            # per-channel bias (sublane bcast)
    o_ref[...] = jnp.maximum(y, 0.0).astype(o_ref.dtype)


# ----------------------------------------------------------------------------
# Wrapper
# ----------------------------------------------------------------------------

def conv1x1_bn_relu_nchw(x_nchw, w2d, scale, bias, *, out_dtype=None,
                         tm_target=1024):
    """relu((scale * W) @ X + bias), per-batch-item, entirely in NCHW layout.

    x_nchw : (N, Cin, H, W) activations
    w2d    : (Cout, Cin)    1x1-conv weight
    scale, bias : (Cout,)   fused BatchNorm affine
    """
    n, cin, h, w = x_nchw.shape
    cout, cin_w = w2d.shape
    assert cin == cin_w, (cin, cin_w)
    hw = h * w
    out_dtype = out_dtype or x_nchw.dtype

    # Pure reshape (no transpose, no HBM copy): (N, Cin, HW).
    x3 = x_nchw.reshape(n, cin, hw)

    # Fold BN scale into the weight; bf16 MXU operand (tiny, resident in VMEM).
    w_fused = (w2d * scale[:, None]).astype(jnp.bfloat16)      # (Cout, Cin)
    b_col = bias.astype(jnp.float32).reshape(cout, 1)          # (Cout, 1)

    # HW tile: full HW when small (always layout-valid), else a 128-aligned
    # slab up to tm_target; the ragged last block is masked by Pallas.
    if hw <= tm_target:
        tm = hw
    else:
        tm = max(128, (tm_target // 128) * 128)
    grid = (n, pl.cdiv(hw, tm))

    out = pl.pallas_call(
        _dr_kernel,
        out_shape=jax.ShapeDtypeStruct((n, cout, hw), out_dtype),
        grid_spec=pltpu.PrefetchScalarGridSpec(
            num_scalar_prefetch=0,
            grid=grid,
            in_specs=[
                # Activations: batch dim squeezed, Cin on sublanes, HW on lanes.
                pl.BlockSpec((None, cin, tm), lambda b, m: (b, 0, m)),
                # Weight + bias: resident across all grid steps.
                pl.BlockSpec((cout, cin), lambda b, m: (0, 0)),
                pl.BlockSpec((cout, 1), lambda b, m: (0, 0)),
            ],
            out_specs=pl.BlockSpec((None, cout, tm), lambda b, m: (b, 0, m)),
        ),
        compiler_params=pltpu.CompilerParams(
            # (batch, HW-tile) are independent -> megacore-shardable on v7x.
            dimension_semantics=("parallel", "parallel"),
        ),
    )(x3, w_fused, b_col)
    return out.reshape(n, cout, h, w)


def dr_forward(x_nchw, params, eps=1e-5):
    """Forward pass of DR: 1x1 conv (no bias) + BN (inference) + ReLU."""
    w = params["conv1_w"]                    # (out_d, in_d, 1, 1)
    gamma, beta, mean, var = params["bn1"]
    out_d, in_d, kh, kw = w.shape
    assert (kh, kw) == (1, 1)
    assert x_nchw.shape[1] == in_d, (x_nchw.shape[1], in_d)

    inv = gamma * jax.lax.rsqrt(var + eps)   # BN scale
    bias = beta - mean * inv                 # BN bias
    w2d = w.reshape(out_d, in_d)

    return conv1x1_bn_relu_nchw(x_nchw, w2d, inv, bias, out_dtype=x_nchw.dtype)


# ----------------------------------------------------------------------------
# Parameter construction (deterministic, mirrors nn.Module.__init__)
# ----------------------------------------------------------------------------

def make_dr_params(key, in_d, out_d):
    # Conv2d(in_d, out_d, 1, bias=False) weight; deterministic normal init.
    std = math.sqrt(2.0 / max(out_d, 1))
    conv1_w = jax.random.normal(key, (out_d, in_d, 1, 1), jnp.float32) * std
    # BatchNorm2d fresh statistics: gamma=1, beta=0, mean=0, var=1.
    bn1 = (jnp.ones((out_d,), jnp.float32), jnp.zeros((out_d,), jnp.float32),
           jnp.zeros((out_d,), jnp.float32), jnp.ones((out_d,), jnp.float32))
    return {"conv1_w": conv1_w, "bn1": bn1}


# ----------------------------------------------------------------------------
# Main
# ----------------------------------------------------------------------------

if __name__ == "__main__":
    key = jax.random.PRNGKey(0)
    k_x, k_w = jax.random.split(key)

    in_d, out_d = 4, 32
    x = jax.random.normal(k_x, (2, in_d, 16, 16), jnp.float32)   # NCHW input

    params = make_dr_params(k_w, in_d, out_d)

    y = jax.block_until_ready(dr_forward(x, params))
    assert y.shape == (2, out_d, 16, 16), y.shape
    assert bool(jnp.isfinite(y).all())

    # Plain-JAX f32 reference (bf16 MXU operands -> modest tolerance).
    gamma, beta, mean, var = params["bn1"]
    inv = gamma / jnp.sqrt(var + 1e-5)
    w2d = params["conv1_w"].reshape(out_d, in_d)
    conv = jnp.einsum("oc,nchw->nohw", w2d, x)
    ref = jnp.maximum(conv * inv[None, :, None, None]
                      + (beta - mean * inv)[None, :, None, None], 0.0)
    max_err = float(jnp.max(jnp.abs(y - ref)))
    assert max_err < 5e-2, f"max abs error vs reference: {max_err}"

    print("KERNEL_OK")
</pallas_src>

<mosaic_0001>
module attributes {stable_mosaic.version = 11 : i64} {
  func.func @_dr_kernel(%arg0: i32, %arg1: i32, %arg2: memref<1x4x256xf32, #tpu.memory_space<vmem>>, %arg3: memref<32x4xbf16, #tpu.memory_space<vmem>>, %arg4: memref<32x1xf32, #tpu.memory_space<vmem>>, %arg5: memref<1x32x256xf32, #tpu.memory_space<vmem>>) attributes {dimension_semantics = [#tpu.dimension_semantics<parallel>, #tpu.dimension_semantics<parallel>], iteration_bounds = array<i64: 2, 1>, scalar_prefetch = 0 : i64, scratch_operands = 0 : i64, tpu.core_type = #tpu.core_type<tc>, window_params = [{transform_indices = @transform_0, window_bounds = array<i64: 1, 4, 256>}, {pipeline_mode = #tpu.pipeline_mode<synchronous>, transform_indices = @transform_1, window_bounds = array<i64: 32, 4>}, {pipeline_mode = #tpu.pipeline_mode<synchronous>, transform_indices = @transform_2, window_bounds = array<i64: 32, 1>}, {transform_indices = @transform_3, window_bounds = array<i64: 1, 32, 256>}]} {
    %c0 = arith.constant 0 : index
    %c0_0 = arith.constant 0 : index
    %c0_1 = arith.constant 0 : index
    %0 = vector.load %arg2[%c0, %c0_0, %c0_1] : memref<1x4x256xf32, #tpu.memory_space<vmem>>, vector<1x4x256xf32>
    %1 = vector.shape_cast %0 : vector<1x4x256xf32> to vector<4x256xf32>
    %2 = arith.truncf %1 : vector<4x256xf32> to vector<4x256xbf16>
    %c0_2 = arith.constant 0 : index
    %c0_3 = arith.constant 0 : index
    %3 = vector.load %arg3[%c0_2, %c0_3] : memref<32x4xbf16, #tpu.memory_space<vmem>>, vector<32x4xbf16>
    %cst = arith.constant dense<0.000000e+00> : vector<32x256xf32>
    %4 = tpu.matmul %3, %2, %cst {dimension_numbers = #tpu.dot_dimension_numbers<[1], [0], [0], [1], [0, 0, 1, 1], [], []>} : vector<32x4xbf16>, vector<4x256xbf16>, vector<32x256xf32> -> vector<32x256xf32>
    %c0_4 = arith.constant 0 : index
    %c0_5 = arith.constant 0 : index
    %5 = vector.load %arg4[%c0_4, %c0_5] : memref<32x1xf32, #tpu.memory_space<vmem>>, vector<32x1xf32>
    %6 = vector.broadcast %5 : vector<32x1xf32> to vector<32x256xf32>
    %7 = arith.addf %4, %6 : vector<32x256xf32>
    %cst_6 = arith.constant 0.000000e+00 : f32
    %8 = vector.broadcast %cst_6 : f32 to vector<32x256xf32>
    %9 = arith.maximumf %7, %8 : vector<32x256xf32>
    %c0_7 = arith.constant 0 : index
    %c0_8 = arith.constant 0 : index
    %c0_9 = arith.constant 0 : index
    %10 = vector.load %arg5[%c0_7, %c0_8, %c0_9] : memref<1x32x256xf32, #tpu.memory_space<vmem>>, vector<1x32x256xf32>
    %11 = vector.shape_cast %10 : vector<1x32x256xf32> to vector<32x256xf32>
    %12 = vector.shape_cast %9 : vector<32x256xf32> to vector<1x32x256xf32>
    tpu.vector_store %arg5[%c0_7, %c0_8, %c0_9], %12 {strides = array<i32>} : memref<1x32x256xf32, #tpu.memory_space<vmem>>, vector<1x32x256xf32>,
    return
  }
  func.func @transform_0(%arg0: i32, %arg1: i32) -> (i32, i32, i32) {
    %c0_i32 = arith.constant 0 : i32
    %c0_i32_0 = arith.constant 0 : i32
    return %arg0, %c0_i32, %arg1 : i32, i32, i32
  }
  func.func @transform_1(%arg0: i32, %arg1: i32) -> (i32, i32) {
    %c0_i32 = arith.constant 0 : i32
    %c0_i32_0 = arith.constant 0 : i32
    %c0_i32_1 = arith.constant 0 : i32
    return %c0_i32, %c0_i32_0 : i32, i32
  }
  func.func @transform_2(%arg0: i32, %arg1: i32) -> (i32, i32) {
    %c0_i32 = arith.constant 0 : i32
    %c0_i32_0 = arith.constant 0 : i32
    %c0_i32_1 = arith.constant 0 : i32
    return %c0_i32, %c0_i32_0 : i32, i32
  }
  func.func @transform_3(%arg0: i32, %arg1: i32) -> (i32, i32, i32) {
    %c0_i32 = arith.constant 0 : i32
    %c0_i32_0 = arith.constant 0 : i32
    return %arg0, %c0_i32, %arg1 : i32, i32, i32
  }
}

</mosaic_0001>

<bundles_post_ra>
// kernel: tpu_custom_call.1
= control target key start
LH: loop header
LB: loop body
LE: loop exit
PB: predicated region body
PF: predicated region fallthrough
CT: control target
= control target key end

     0   :  { %8 = vsyncpa [#allocation3], 0  ;;  %s746_s0 = inlined_call_operand.vmem [shape: f32[2,4,256], index: 0, kind: input, shape index: {}]   ;;  %s747_s1 = inlined_call_operand.vmem [shape: bf16[32,4], index: 1, kind: input, shape index: {}]   ;;  %s748_s2 = inlined_call_operand.vmem [shape: f32[32,1], index: 2, kind: input, shape index: {}]   ;;  %s749_s3 = inlined_call_operand.hbm [shape: f32[2,32,256], index: 3, kind: output, shape index: {}]  }
   0x1   :  { %10 = vsyncpa [#allocation3 + $0x1], 0  ;;  %s610_s12 = smov 0   ;;  %s612_s13 = smov 0  }
   0x2   :  { %s614_s14 = smov 0   ;;  %s616_s15 = smov 0  }
   0x3   :  { %s618_s16 = smov 0   ;;  %s620_s17 = smov 0  }
   0x4 LB: > { %s423_s18 = sadd.s32 4294967295, %s584_s17   ;;  %s424_s19 = sadd.s32 4294967294, %s584_s17   ;;  %s584_s17 = sphi %s620_s17, %s16_s17   ;;  %s580_s16 = sphi %s618_s16, %s756_s16   ;;  %s576_s15 = sphi %s616_s15, %s755_s15   ;;  %s572_s14 = sphi %s614_s14, %s754_s14   ;;  %s568_s13 = sphi %s612_s13, %s753_s13   ;;  %s564_s12 = sphi %s610_s12, %s752_s12  }
   0x5   : > { %s28_s20 = sadd.s32 1, %s580_s16  ;;  %s107_s21 = sadd.s32 1, %s572_s14 }
   0x6   : > { %p30_p0 = scmp.ge.s32.totalorder %s28_s20, 2  ;;  %p117_p1 = scmp.ne.s32.totalorder %s572_s14, %s568_s13 }
   0x7   : > { %p118_p2 = scmp.eq.s32.totalorder %s423_s18, 1  ;;  %p123_p3 = scmp.ne.s32.totalorder %s568_s13, %s564_s12 }
   0x8   : > { %s758_s20 = smov (%p30_p0, %s28_s20), 0  ;;  %p124_p5 = scmp.eq.s32.totalorder %s424_s19, 1 }
   0x9   : > { %p650_p4 = por %p118_p2, %p117_p1  ;;  %s102_s23 = ssub.s32 %s580_s16, %s758_s20 }
   0xa   : > { %p427_p6 = scmp.ge.s32.totalorder %s584_s17, 1  ;;  %p105_p7 = scmp.eq.s32.totalorder %s102_s23, 0 }
   0xb   : > { %p657_p8 = por %p124_p5, %p123_p3  ;;  %p161_p9 = scmp.lt.s32.totalorder %s584_s17, 3 }
   0xc   : > { %s663_s25 = scalar_select %p105_p7, %s572_s14, %s107_s21  }
   0xd   : > { %p162_p10 = pnand %p427_p6, %p161_p9 }
   0xe   : > { %p190_p11 = scmp.lt.s32.totalorder (!%p162_p10), %s576_s15, 1  ;;  %s442_s29 = sshll.u32 (!%p162_p10), %s576_s15, 10 }
   0xf   : > { %165 = sbr.rel (%p162_p10) target bundleno = 250 (0xfa), region = 32  ;;  %s695_s6 = scalar_lea.hbm (!%p162_p10), %s749_s3, %s442_s29 }
  0x10   : > { %s587_s8 = smov (!%p162_p10), [#allocation2]  }
  0x11   : > { %s512_s9 = sshll.u32 (!%p162_p10), %s587_s8, 4  ;;  %s513_s9 = int_to_ptr.vmem [resolvable:$false] %s512_s9 }
  0x12   : > { %s514_s10 = scalar_lea.vmem (!%p162_p10), %s513_s9, 2048 }
  0x14   : > { %v586_v0 = vmov 0   ;;  %s191_s26 = scalar_select %p190_p11, %s576_s15, 1  ;;  %v213_v1 = vld [vmem:[%s748_s2 + $0x10] sm:$0xff]  ;;  %v211_v2 = vld [vmem:[%s748_s2] sm:$0xff]  ;;  %v214_v3 = vld [vmem:[%s748_s2 + $0x18] sm:$0xff]  ;;  %vm252_vm0 = vcmask 1041408  }
  0x15   : > { %291 = vmatprep.mubr.bf16.mxu0 %v586_v0  ;;  %301 = vmatprep.mubr.bf16.mxu1 %v586_v0  ;;  %v212_v4 = vld [vmem:[%s748_s2 + $0x8] sm:$0xff]  ;;  %v506_v10 = vld [vmem:[%s747_s1] sm:$0xff]   ;;  %vm245_vm1 = vcmask 31744  }
  0x16   : > { %504 = vset.pattern.permute.xlu1 %v586_v0  ;;  %503 = vset.pattern.permute.xlu0 %v586_v0  ;;  %s441_s4 = sshll.u32 %s191_s26, 3  ;;  %v507_v11 = vld [vmem:[%s747_s1 + $0x8] sm:$0xff]   ;;  %s186_s26 = sand.u32 1, %s568_s13  }
  0x17   : > { %227 = vperm.xlu1 %504, %v213_v1   ;;  %217 = vperm.xlu0 %503, %v211_v2   ;;  %s197_s11 = scalar_lea.vmem %s746_s0, %s441_s4  ;;  %s428_s27 = sshll.u32 %s186_s26, 6 }
  0x18   : > { %v201_v5 = vld [vmem:[%s197_s11] sm:$0xff]  ;;  %s188_s28 = scalar_lea.vmem [#allocation2], %s428_s27  ;;  %s701_s15 = scalar_lea.sflag [#allocation3], %s186_s26 }
  0x19   : > { %v203_v6 = vcombine.high %v201_v5, %v201_v5  ;;  %v205_v7 = vpack.c.bf16 %v201_v5, %v201_v5  ;;  %s344_s30 = sshll.u32 %s188_s28, 4  ;;  %s697_s30 = int_to_ptr.vmem [resolvable:$true] %s344_s30 }
  0x1a   : > { %s508_s7 = scalar_lea.vmem %s697_s30, 1024  ;;  %p515_p1 = scmp.lt.s32.totalorder %s697_s30, %s513_s9 }
  0x1b   : > { %232 = vperm.xlu1 %504, %v214_v3   ;;  %222 = vperm.xlu0 %503, %v212_v4   ;;  %v206_v8 = vpack.c.bf16 %v203_v6, %v203_v6  ;;  %v254_v9 = vsel %vm252_vm0, %v205_v7, 0  ;;  %p509_p12 = scmp.ne.s32.totalorder %s697_s30, %s508_s7  ;;  %p516_p2 = scmp.lt.s32.totalorder %s514_s10, %s508_s7 }
  0x1d   : > { %433 = vmatprep.subr.msk.bf16.mxu0 %vm252_vm0, %v206_v8  ;;  %443 = vmatprep.subr.msk.bf16.mxu1 %vm252_vm0, %v206_v8  ;;  %p510_p13 = pnand %p509_p12, %p650_p4  ;;  %p517_p3 = por %p516_p2, %p515_p1 }
  0x1e   : > { %274 = vmatpush1.bf16.msra.mxu0 %v254_v9  ;;  %444 = vmatpush1.bf16.msra.mxu1 %v254_v9 }
  0x1f   : > { %p511_p0 = pneg %p510_p13 }
  0x21   : > { %434 = vmatmul.mubr.msk.bf16.vlgmr.msra.gmra.mxu0 %vm245_vm1, %v506_v10  ;;  %435 = vmatmul.mubr.msk.bf16.vlgmr.msra.gmra.mxu1 %vm245_vm1, %v507_v11  ;;  %p518_p5 = pnand %p517_p3, %p511_p0 }
  0x92   : > { %v228_v12 = vpop.permute.xlu1 %227  ;;  %v218_v13 = vpop.permute.xlu0 %217 }
  0x96   : > { %v233_v22 = vpop.permute.xlu1 %232  ;;  %v223_v23 = vpop.permute.xlu0 %222 }
  0xe1   : > { %v293_v14 = vpop.f32.mrf.mxu0  ;;  %v303_v15 = vpop.f32.mrf.mxu1 }
  0xe2   : > { %v294_v16 = vadd.f32 %v293_v14, %v218_v13  ;;  %v304_v17 = vadd.f32 %v303_v15, %v228_v12 }
  0xe3   : > { %v295_v18 = vpop.f32.mrf.mxu0  ;;  %v305_v19 = vpop.f32.mrf.mxu1 }
  0xe4   : > { %v312_v20 = vmax.f32 %v294_v16, 0.0  ;;  %v316_v21 = vmax.f32 %v304_v17, 0.0  ;;  %v296_v24 = vadd.f32 %v295_v18, %v218_v13  ;;  %v306_v25 = vadd.f32 %v305_v19, %v228_v12 }
  0xe5   : > { %v297_v26 = vpop.f32.mrf.mxu0  ;;  %v307_v27 = vpop.f32.mrf.mxu1 }
  0xe6   : > { %320 = vst [vmem:[%s188_s28] sm:$0xff] %v312_v20  ;;  %324 = vst [vmem:[%s188_s28 + $0x20] sm:$0xff] %v316_v21  ;;  %v313_v28 = vmax.f32 %v296_v24, 0.0  ;;  %v317_v29 = vmax.f32 %v306_v25, 0.0  ;;  %v298_v30 = vadd.f32 %v297_v26, %v223_v23  ;;  %v308_v31 = vadd.f32 %v307_v27, %v233_v22 }
  0xe7   : > { %v299_v32 = vpop.f32.mrf.mxu0  ;;  %v309_v33 = vpop.f32.mrf.mxu1 }
  0xe8   : > { %321 = vst [vmem:[%s188_s28 + $0x8] sm:$0xff] %v313_v28  ;;  %325 = vst [vmem:[%s188_s28 + $0x28] sm:$0xff] %v317_v29  ;;  %v314_v34 = vmax.f32 %v298_v30, 0.0  ;;  %v318_v35 = vmax.f32 %v308_v31, 0.0  ;;  %v300_v36 = vadd.f32 %v299_v32, %v223_v23  ;;  %v310_v37 = vadd.f32 %v309_v33, %v233_v22 }
  0xea   : > { %322 = vst [vmem:[%s188_s28 + $0x10] sm:$0xff] %v314_v34  ;;  %326 = vst [vmem:[%s188_s28 + $0x30] sm:$0xff] %v318_v35  ;;  %v315_v38 = vmax.f32 %v300_v36, 0.0  ;;  %v319_v39 = vmax.f32 %v310_v37, 0.0 }
  0xec   : > { %323 = vst [vmem:[%s188_s28 + $0x18] sm:$0xff] %v315_v38  ;;  %327 = vst [vmem:[%s188_s28 + $0x38] sm:$0xff] %v319_v39 }
  0xed   : > { %521 = shalt.err (!%p518_p5)
}
  0xee   : > { %s522_s11 = scalar_lea.hbm %s695_s6, 1024  ;;  %s526_s21 = scalar_lea.hbm %s749_s3, 2048 }
  0xef   : > { %p523_p6 = scmp.ne.s32.totalorder %s695_s6, %s522_s11  ;;  %p527_p10 = scmp.lt.s32.totalorder %s695_s6, %s749_s3 }
  0xf0   : > { %p528_p11 = scmp.lt.s32.totalorder %s526_s21, %s522_s11 }
  0xf1   : > { %p524_p7 = pnand %p523_p6, %p650_p4 }
  0xf2   : > { %p529_p12 = por %p528_p11, %p527_p10 }
  0xf3   : > { %p525_p9 = pneg %p524_p7 }
  0xf5   : > { %p530_p13 = pnand %p529_p12, %p525_p9 }
  0xf7   : > { %533 = shalt.err (!%p530_p13)
}
  0xf8   : > { %s588_s27 = smov 256   ;;  %s589_s28 = smov 16  }
  0xf9   : > { %445 = dma.vmem_to_hbm [thread:$0]  (%p650_p4), %s697_s30, 1024, %s695_s6, %s701_s15, %s588_s27, %s588_s27, %s589_s28  }
  0xfa PF: > { %p451_p0 = scmp.ge.s32.totalorder %s584_s17, 2  ;;  %s359_s29 = sand.u32 1, %s564_s12  }
  0xfb   : > { %s360_s4 = scalar_lea.sflag [#allocation3], %s359_s29 }
  0xfc   : > { %p448_p1 = pnand %p451_p0, %p657_p8 }
  0xfe   : > { %p449_p2 = pneg %p448_p1 }
 0x100   : > { %559 = dma.done.wait (%p449_p2), %s360_s4, 1024  }
 0x101   : > { %561 = vsyncadd (%p449_p2), %s360_s4, 4294966272  ;;  %s16_s17 = sadd.s32 1, %s584_s17   ;;  %s752_s12 = smov %s568_s13 }
 0x102   : > { %p13_p3 = scmp.ge.s32.totalorder %s16_s17, 4   ;;  %s753_s13 = smov %s572_s14 }
 0x103   : > { %s754_s14 = smov %s663_s25  ;;  %s755_s15 = smov %s580_s16 }
 0x104   : > { %s756_s16 = smov %s758_s20  ;;  %15 = sbr.rel (!%p13_p3) target bundleno = 4 (0x4), region = 67 }
 0x109   :  { %365 = vsyncpa [#allocation3], 1 }
 0x10a   :  { %367 = vsyncpa [#allocation3 + $0x1], 1 }

</bundles_post_ra>
